<compile_context>
chip_gen: v7x
topology: tpu7x:2x2x1
jax: 0.10.0
libtpu: 0.0.40
codegen_flags: <defaults>
</compile_context>

<pallas_src>
import jax
import jax.numpy as jnp
from jax.experimental import pallas as pl
from jax.experimental.pallas import tpu as pltpu


def _patch_unembed_kernel(x_ref, o_ref):
    # x_ref: (TQ, C)   o_ref: (C, TQ)   -- one clean 2-D XLU transpose.
    o_ref[...] = jnp.transpose(x_ref[...], (1, 0))


def _choose_tq(HW, C, dtype, budget_bytes=2 * 1024 * 1024):
    """Largest HW tile that (a) divides HW, (b) keeps the output lane dim a
    multiple of the lane quantum (dense vst), and (c) keeps one block within
    `budget_bytes` so double-buffered VMEM stays small on every chip."""
    itemsize = jnp.dtype(dtype).itemsize
    # 128 for >=32-bit, 256 for bf16/fp16, 512 for int8/fp8 so the transpose
    # moves whole packed sublane groups.
    lane_quantum = 128 * max(1, 4 // itemsize)
    if HW < lane_quantum:
        return HW
    row_bytes = max(1, C * itemsize)
    max_tq = min(HW, budget_bytes // row_bytes)
    max_tq -= max_tq % lane_quantum
    if max_tq < lane_quantum:
        # Very wide C: fall back to the smallest lane-dense tile.
        max_tq = lane_quantum
    tq = max_tq
    while tq >= lane_quantum:
        if HW % tq == 0:
            return tq
        tq -= lane_quantum
    # Fallback for HW with no multiple-of-lane_quantum divisor: whole-HW block.
    # Full-extent dims are exempt from the (8,128) divisibility rule.
    return HW


def patch_unembed(x, x_size, embed_dim, *, tq=None):
    """x: (B, HW, C) -> (B, embed_dim, H, W), mirroring PatchUnEmbed.forward."""
    B, HW, C = x.shape
    H, W = x_size
    assert C == embed_dim, "channel dim must equal embed_dim"
    assert HW == H * W, "token count must equal H*W"

    if tq is None:
        tq = _choose_tq(HW, C, x.dtype)
    assert HW % tq == 0, "tile must divide HW"
    grid = (B, HW // tq)

    out = pl.pallas_call(
        _patch_unembed_kernel,
        out_shape=jax.ShapeDtypeStruct((B, C, HW), x.dtype),
        grid_spec=pltpu.PrefetchScalarGridSpec(
            num_scalar_prefetch=0,
            grid=grid,
            # Batch dim squeezed out of the kernel view; HW tiled by tq.
            in_specs=[
                pl.BlockSpec((pl.Squeezed(), tq, C), lambda b, i: (b, i, 0)),
            ],
            # Transpose expressed in the out_spec: the HW-tile index i moves to
            # the last (lane) axis, which stays a multiple of 128 -> dense vst.
            out_specs=pl.BlockSpec((pl.Squeezed(), C, tq), lambda b, i: (b, 0, i)),
        ),
        compiler_params=pltpu.CompilerParams(
            # Both axes independent -> shards across v7x's two TensorCores even
            # when B == 1; harmless on v5e/v6e (single TC).
            dimension_semantics=("parallel", "parallel"),
        ),
    )(x)

    # Glue reshape (no data movement): (B, C, HW) -> (B, C, H, W)
    return out.reshape(B, embed_dim, H, W)


if __name__ == "__main__":
    # Small shapes consistent with the module: B=2, H=W=32 -> HW=1024, C=32.
    B, H, W = 2, 32, 32
    embed_dim = 32
    HW = H * W

    key = jax.random.PRNGKey(0)
    x = jax.random.normal(key, (B, HW, embed_dim), dtype=jnp.float32)

    # Reference: pure-JAX equivalent of the PyTorch forward.
    y_ref = jnp.transpose(x, (0, 2, 1)).reshape(B, embed_dim, H, W)

    # Default path (auto-selected TQ; one tile per batch at this small size).
    y = jax.block_until_ready(patch_unembed(x, (H, W), embed_dim))
    assert y.shape == (B, embed_dim, H, W)
    assert jnp.array_equal(y, y_ref)

    # Also exercise the multi-tile path (grid=(2, 4)) used at realistic sizes.
    y_tiled = jax.block_until_ready(patch_unembed(x, (H, W), embed_dim, tq=256))
    assert jnp.array_equal(y_tiled, y_ref)

    print("KERNEL_OK")
</pallas_src>

<mosaic_0001>
module attributes {stable_mosaic.version = 11 : i64} {
  func.func @_patch_unembed_kernel(%arg0: i32, %arg1: i32, %arg2: memref<1x1024x32xf32, #tpu.memory_space<vmem>>, %arg3: memref<1x32x1024xf32, #tpu.memory_space<vmem>>) attributes {dimension_semantics = [#tpu.dimension_semantics<parallel>, #tpu.dimension_semantics<parallel>], iteration_bounds = array<i64: 2, 1>, scalar_prefetch = 0 : i64, scratch_operands = 0 : i64, tpu.core_type = #tpu.core_type<tc>, window_params = [{transform_indices = @transform_0, window_bounds = array<i64: 1, 1024, 32>}, {transform_indices = @transform_1, window_bounds = array<i64: 1, 32, 1024>}]} {
    %c0 = arith.constant 0 : index
    %c0_0 = arith.constant 0 : index
    %c0_1 = arith.constant 0 : index
    %0 = vector.load %arg2[%c0, %c0_0, %c0_1] : memref<1x1024x32xf32, #tpu.memory_space<vmem>>, vector<1x1024x32xf32>
    %1 = vector.shape_cast %0 : vector<1x1024x32xf32> to vector<1024x32xf32>
    %2 = tpu.transpose %1, [1, 0] : vector<1024x32xf32> -> vector<32x1024xf32>
    %c0_2 = arith.constant 0 : index
    %c0_3 = arith.constant 0 : index
    %c0_4 = arith.constant 0 : index
    %3 = vector.load %arg3[%c0_2, %c0_3, %c0_4] : memref<1x32x1024xf32, #tpu.memory_space<vmem>>, vector<1x32x1024xf32>
    %4 = vector.shape_cast %3 : vector<1x32x1024xf32> to vector<32x1024xf32>
    %5 = vector.shape_cast %2 : vector<32x1024xf32> to vector<1x32x1024xf32>
    tpu.vector_store %arg3[%c0_2, %c0_3, %c0_4], %5 {strides = array<i32>} : memref<1x32x1024xf32, #tpu.memory_space<vmem>>, vector<1x32x1024xf32>,
    return
  }
  func.func @transform_0(%arg0: i32, %arg1: i32) -> (i32, i32, i32) {
    %c0_i32 = arith.constant 0 : i32
    %c0_i32_0 = arith.constant 0 : i32
    return %arg0, %arg1, %c0_i32 : i32, i32, i32
  }
  func.func @transform_1(%arg0: i32, %arg1: i32) -> (i32, i32, i32) {
    %c0_i32 = arith.constant 0 : i32
    %c0_i32_0 = arith.constant 0 : i32
    return %arg0, %c0_i32, %arg1 : i32, i32, i32
  }
}

</mosaic_0001>

<bundles_post_ra>
// kernel: tpu_custom_call.1
= control target key start
LH: loop header
LB: loop body
LE: loop exit
PB: predicated region body
PF: predicated region fallthrough
CT: control target
= control target key end

     0   :  { %6 = vsyncpa [#allocation3], 0  ;;  %s1106_s0 = inlined_call_operand.vmem [shape: f32[2,1024,32], index: 0, kind: input, shape index: {}]   ;;  %s1107_s1 = inlined_call_operand.hbm [shape: f32[2,32,1024], index: 1, kind: output, shape index: {}]  }
   0x1   :  { %8 = vsyncpa [#allocation3 + $0x1], 0  ;;  %s822_s6 = smov 0   ;;  %s824_s7 = smov 0  }
   0x2   :  { %s826_s8 = smov 0   ;;  %s828_s9 = smov 0  }
   0x3   :  { %s830_s10 = smov 0   ;;  %s832_s11 = smov 0  }
   0x4 LB: > { %s657_s12 = sadd.s32 4294967295, %s807_s11   ;;  %s658_s13 = sadd.s32 4294967294, %s807_s11   ;;  %s807_s11 = sphi %s832_s11, %s14_s11   ;;  %s803_s10 = sphi %s830_s10, %s1114_s10   ;;  %s799_s9 = sphi %s828_s9, %s1113_s9   ;;  %s795_s8 = sphi %s826_s8, %s1112_s8   ;;  %s791_s7 = sphi %s824_s7, %s1111_s7   ;;  %s787_s6 = sphi %s822_s6, %s1110_s6  }
   0x5   : > { %s26_s14 = sadd.s32 1, %s803_s10  ;;  %s63_s15 = sadd.s32 1, %s795_s8 }
   0x6   : > { %p28_p0 = scmp.ge.s32.totalorder %s26_s14, 2  ;;  %p73_p1 = scmp.ne.s32.totalorder %s795_s8, %s791_s7 }
   0x7   : > { %p74_p2 = scmp.eq.s32.totalorder %s657_s12, 1  ;;  %p79_p3 = scmp.ne.s32.totalorder %s791_s7, %s787_s6 }
   0x8   : > { %s1116_s14 = smov (%p28_p0, %s26_s14), 0  ;;  %p80_p5 = scmp.eq.s32.totalorder %s658_s13, 1 }
   0x9   : > { %p862_p4 = por %p74_p2, %p73_p1  ;;  %s58_s17 = ssub.s32 %s803_s10, %s1116_s14 }
   0xa   : > { %p661_p6 = scmp.ge.s32.totalorder %s807_s11, 1  ;;  %p61_p7 = scmp.eq.s32.totalorder %s58_s17, 0 }
   0xb   : > { %p869_p8 = por %p80_p5, %p79_p3  ;;  %p111_p9 = scmp.lt.s32.totalorder %s807_s11, 3 }
   0xc   : > { %s875_s19 = scalar_select %p61_p7, %s795_s8, %s63_s15  }
   0xd   : > { %p112_p10 = pnand %p661_p6, %p111_p9 }
   0xe   : > { %p136_p11 = scmp.lt.s32.totalorder (!%p112_p10), %s799_s9, 1  ;;  %s132_s25 = sand.u32 (!%p112_p10), 1, %s791_s7  }
   0xf   : > { %115 = sbr.rel (%p112_p10) target bundleno = 376 (0x178), region = 24  ;;  %s662_s26 = sshll.u32 (!%p112_p10), %s132_s25, 8 }
  0x10   : > { %s955_s27 = scalar_lea.vmem (!%p112_p10), [#allocation2], %s662_s26  ;;  %s671_s28 = sshll.u32 (!%p112_p10), %s799_s9, 12 }
  0x11   : > { %s578_s29 = sshll.u32 (!%p112_p10), %s955_s27, 4  ;;  %s1052_s3 = scalar_lea.hbm (!%p112_p10), %s1107_s1, %s671_s28  ;;  %s1054_s29 = int_to_ptr.vmem [resolvable:$true] %s578_s29 }
  0x12   : > { %s1060_s4 = scalar_lea.sflag (!%p112_p10), [#allocation3], %s132_s25  ;;  %s729_s5 = scalar_lea.vmem (!%p112_p10), %s1054_s29, 4096 }
  0x13   : > { %p730_p12 = scmp.ne.s32.totalorder (!%p112_p10), %s1054_s29, %s729_s5 }
  0x15   : > { %p731_p13 = pnand (!%p112_p10), %p730_p12, %p862_p4 }
  0x16   : > { %s137_s20 = scalar_select %p136_p11, %s799_s9, 1 }
  0x17   : > { %p732_p0 = pneg %p731_p13  ;;  %s809_s9 = smov [#allocation2]  }
  0x18   : > { %s670_s21 = sshll.u32 %s137_s20, 10  ;;  %s733_s12 = sshll.u32 %s809_s9, 4  ;;  %s734_s12 = int_to_ptr.vmem [resolvable:$false] %s733_s12 }
  0x19   : > { %s882_s24 = scalar_lea.vmem %s1106_s0, %s670_s21  ;;  %s735_s13 = scalar_lea.vmem %s734_s12, 8192 }
  0x1a   : > { %v162_v0 = vld [vmem:[%s882_s24 + $0x80] sm:$0xff]  ;;  %v163_v2 = vld [vmem:[%s882_s24 + $0x88] sm:$0xff]  ;;  %v164_v4 = vld [vmem:[%s882_s24 + $0x90] sm:$0xff]  ;;  %p736_p1 = scmp.lt.s32.totalorder %s1054_s29, %s734_s12  ;;  %p737_p2 = scmp.lt.s32.totalorder %s735_s13, %s729_s5 }
  0x1b   : > { %v146_v1 = vld [vmem:[%s882_s24] sm:$0xff]  ;;  %306 = vxpose.xlu1.b32.start [1/16] (narrow) %v162_v0, 32  ;;  %v147_v3 = vld [vmem:[%s882_s24 + $0x8] sm:$0xff]  ;;  %v148_v5 = vld [vmem:[%s882_s24 + $0x10] sm:$0xff] }
  0x1c   : > { %274 = vxpose.xlu0.b32.start [1/16] (narrow) %v146_v1, 32  ;;  %v165_v6 = vld [vmem:[%s882_s24 + $0x98] sm:$0xff]  ;;  %v166_v8 = vld [vmem:[%s882_s24 + $0xa0] sm:$0xff]  ;;  %v167_v10 = vld [vmem:[%s882_s24 + $0xa8] sm:$0xff]  ;;  %p738_p3 = por %p737_p2, %p736_p1 }
  0x1d   : > { %v149_v7 = vld [vmem:[%s882_s24 + $0x18] sm:$0xff]  ;;  %v150_v9 = vld [vmem:[%s882_s24 + $0x20] sm:$0xff]  ;;  %v151_v11 = vld [vmem:[%s882_s24 + $0x28] sm:$0xff] }
  0x1e   : > { %v168_v12 = vld [vmem:[%s882_s24 + $0xb0] sm:$0xff]  ;;  %v169_v14 = vld [vmem:[%s882_s24 + $0xb8] sm:$0xff]  ;;  %v170_v16 = vld [vmem:[%s882_s24 + $0xc0] sm:$0xff]  ;;  %p739_p5 = pnand %p738_p3, %p732_p0 }
  0x1f   : > { %307 = vxpose.xlu1.b32.cont [2/16] (narrow) %v163_v2, 32  ;;  %v152_v13 = vld [vmem:[%s882_s24 + $0x30] sm:$0xff]  ;;  %v153_v15 = vld [vmem:[%s882_s24 + $0x38] sm:$0xff]  ;;  %v154_v17 = vld [vmem:[%s882_s24 + $0x40] sm:$0xff] }
  0x20   : > { %275 = vxpose.xlu0.b32.cont [2/16] (narrow) %v147_v3, 32  ;;  %v171_v18 = vld [vmem:[%s882_s24 + $0xc8] sm:$0xff]  ;;  %v172_v20 = vld [vmem:[%s882_s24 + $0xd0] sm:$0xff]  ;;  %v173_v22 = vld [vmem:[%s882_s24 + $0xd8] sm:$0xff] }
  0x21   : > { %v155_v19 = vld [vmem:[%s882_s24 + $0x48] sm:$0xff]  ;;  %v156_v21 = vld [vmem:[%s882_s24 + $0x50] sm:$0xff]  ;;  %v157_v23 = vld [vmem:[%s882_s24 + $0x58] sm:$0xff] }
  0x22   : > { %v174_v24 = vld [vmem:[%s882_s24 + $0xe0] sm:$0xff]  ;;  %v175_v26 = vld [vmem:[%s882_s24 + $0xe8] sm:$0xff]  ;;  %v176_v28 = vld [vmem:[%s882_s24 + $0xf0] sm:$0xff] }
  0x23   : > { %308 = vxpose.xlu1.b32.cont [3/16] (narrow) %v164_v4, 32  ;;  %v158_v25 = vld [vmem:[%s882_s24 + $0x60] sm:$0xff]  ;;  %v159_v27 = vld [vmem:[%s882_s24 + $0x68] sm:$0xff]  ;;  %v160_v29 = vld [vmem:[%s882_s24 + $0x70] sm:$0xff] }
  0x24   : > { %276 = vxpose.xlu0.b32.cont [3/16] (narrow) %v148_v5, 32  ;;  %v177_v30 = vld [vmem:[%s882_s24 + $0xf8] sm:$0xff]  ;;  %v194_v32 = vld [vmem:[%s882_s24 + $0x180] sm:$0xff]  ;;  %v195_v34 = vld [vmem:[%s882_s24 + $0x188] sm:$0xff] }
  0x25   : > { %v161_v31 = vld [vmem:[%s882_s24 + $0x78] sm:$0xff]  ;;  %v178_v33 = vld [vmem:[%s882_s24 + $0x100] sm:$0xff]  ;;  %v179_v35 = vld [vmem:[%s882_s24 + $0x108] sm:$0xff] }
  0x26   : > { %v196_v36 = vld [vmem:[%s882_s24 + $0x190] sm:$0xff]  ;;  %v197_v38 = vld [vmem:[%s882_s24 + $0x198] sm:$0xff]  ;;  %v198_v40 = vld [vmem:[%s882_s24 + $0x1a0] sm:$0xff] }
  0x27   : > { %309 = vxpose.xlu1.b32.cont [4/16] (narrow) %v165_v6, 32  ;;  %v180_v37 = vld [vmem:[%s882_s24 + $0x110] sm:$0xff]  ;;  %v181_v39 = vld [vmem:[%s882_s24 + $0x118] sm:$0xff]  ;;  %v182_v41 = vld [vmem:[%s882_s24 + $0x120] sm:$0xff] }
  0x28   : > { %277 = vxpose.xlu0.b32.cont [4/16] (narrow) %v149_v7, 32  ;;  %v199_v42 = vld [vmem:[%s882_s24 + $0x1a8] sm:$0xff]  ;;  %v200_v44 = vld [vmem:[%s882_s24 + $0x1b0] sm:$0xff]  ;;  %v201_v46 = vld [vmem:[%s882_s24 + $0x1b8] sm:$0xff] }
  0x29   : > { %v183_v43 = vld [vmem:[%s882_s24 + $0x128] sm:$0xff]  ;;  %v184_v45 = vld [vmem:[%s882_s24 + $0x130] sm:$0xff]  ;;  %v185_v47 = vld [vmem:[%s882_s24 + $0x138] sm:$0xff] }
  0x2a   : > { %v202_v48 = vld [vmem:[%s882_s24 + $0x1c0] sm:$0xff]  ;;  %v203_v50 = vld [vmem:[%s882_s24 + $0x1c8] sm:$0xff]  ;;  %v204_v52 = vld [vmem:[%s882_s24 + $0x1d0] sm:$0xff] }
  0x2b   : > { %310 = vxpose.xlu1.b32.cont [5/16] (narrow) %v166_v8, 32  ;;  %v186_v49 = vld [vmem:[%s882_s24 + $0x140] sm:$0xff]  ;;  %v187_v51 = vld [vmem:[%s882_s24 + $0x148] sm:$0xff]  ;;  %v188_v53 = vld [vmem:[%s882_s24 + $0x150] sm:$0xff] }
  0x2c   : > { %278 = vxpose.xlu0.b32.cont [5/16] (narrow) %v150_v9, 32  ;;  %v205_v54 = vld [vmem:[%s882_s24 + $0x1d8] sm:$0xff]  ;;  %v206_v56 = vld [vmem:[%s882_s24 + $0x1e0] sm:$0xff]  ;;  %v207_v58 = vld [vmem:[%s882_s24 + $0x1e8] sm:$0xff] }
  0x2d   : > { %v189_v55 = vld [vmem:[%s882_s24 + $0x158] sm:$0xff]  ;;  %v190_v57 = vld [vmem:[%s882_s24 + $0x160] sm:$0xff]  ;;  %v191_v59 = vld [vmem:[%s882_s24 + $0x168] sm:$0xff] }
  0x2e   : > { %v208_v60 = vld [vmem:[%s882_s24 + $0x1f0] sm:$0xff]  ;;  %v209_v62 = vld [vmem:[%s882_s24 + $0x1f8] sm:$0xff]  ;;  %v226_v0 = vld [vmem:[%s882_s24 + $0x280] sm:$0xff] }
  0x2f   : > { %311 = vxpose.xlu1.b32.cont [6/16] (narrow) %v167_v10, 32  ;;  %v192_v61 = vld [vmem:[%s882_s24 + $0x170] sm:$0xff]  ;;  %v193_v63 = vld [vmem:[%s882_s24 + $0x178] sm:$0xff]  ;;  %v210_v1 = vld [vmem:[%s882_s24 + $0x200] sm:$0xff] }
  0x30   : > { %279 = vxpose.xlu0.b32.cont [6/16] (narrow) %v151_v11, 32  ;;  %v227_v4 = vld [vmem:[%s882_s24 + $0x288] sm:$0xff]  ;;  %v228_v8 = vld [vmem:[%s882_s24 + $0x290] sm:$0xff] }
  0x31   : > { %v211_v5 = vld [vmem:[%s882_s24 + $0x208] sm:$0xff]  ;;  %v212_v9 = vld [vmem:[%s882_s24 + $0x210] sm:$0xff] }
  0x33   : > { %312 = vxpose.xlu1.b32.cont [7/16] (narrow) %v168_v12, 32  ;;  %v229_v12 = vld [vmem:[%s882_s24 + $0x298] sm:$0xff] }
  0x34   : > { %280 = vxpose.xlu0.b32.cont [7/16] (narrow) %v152_v13, 32  ;;  %v213_v13 = vld [vmem:[%s882_s24 + $0x218] sm:$0xff] }
  0x37   : > { %313 = vxpose.xlu1.b32.cont [8/16] (narrow) %v169_v14, 32 }
  0x38   : > { %281 = vxpose.xlu0.b32.cont [8/16] (narrow) %v153_v15, 32 }
  0x3b   : > { %314 = vxpose.xlu1.b32.cont [9/16] (narrow) %v170_v16, 32  ;;  %v230_v16 = vld [vmem:[%s882_s24 + $0x2a0] sm:$0xff] }
  0x3c   : > { %282 = vxpose.xlu0.b32.cont [9/16] (narrow) %v154_v17, 32  ;;  %v214_v17 = vld [vmem:[%s882_s24 + $0x220] sm:$0xff] }
  0x3f   : > { %315 = vxpose.xlu1.b32.cont [10/16] (narrow) %v171_v18, 32  ;;  %v231_v18 = vld [vmem:[%s882_s24 + $0x2a8] sm:$0xff] }
  0x40   : > { %283 = vxpose.xlu0.b32.cont [10/16] (narrow) %v155_v19, 32  ;;  %v215_v19 = vld [vmem:[%s882_s24 + $0x228] sm:$0xff] }
  0x43   : > { %316 = vxpose.xlu1.b32.cont [11/16] (narrow) %v172_v20, 32  ;;  %v232_v20 = vld [vmem:[%s882_s24 + $0x2b0] sm:$0xff] }
  0x44   : > { %284 = vxpose.xlu0.b32.cont [11/16] (narrow) %v156_v21, 32  ;;  %v216_v21 = vld [vmem:[%s882_s24 + $0x230] sm:$0xff] }
  0x47   : > { %317 = vxpose.xlu1.b32.cont [12/16] (narrow) %v173_v22, 32  ;;  %v233_v22 = vld [vmem:[%s882_s24 + $0x2b8] sm:$0xff] }
  0x48   : > { %285 = vxpose.xlu0.b32.cont [12/16] (narrow) %v157_v23, 32  ;;  %v217_v23 = vld [vmem:[%s882_s24 + $0x238] sm:$0xff] }
  0x4b   : > { %318 = vxpose.xlu1.b32.cont [13/16] (narrow) %v174_v24, 32  ;;  %v234_v24 = vld [vmem:[%s882_s24 + $0x2c0] sm:$0xff] }
  0x4c   : > { %286 = vxpose.xlu0.b32.cont [13/16] (narrow) %v158_v25, 32  ;;  %v218_v25 = vld [vmem:[%s882_s24 + $0x240] sm:$0xff] }
  0x4f   : > { %319 = vxpose.xlu1.b32.cont [14/16] (narrow) %v175_v26, 32  ;;  %v235_v26 = vld [vmem:[%s882_s24 + $0x2c8] sm:$0xff] }
  0x50   : > { %287 = vxpose.xlu0.b32.cont [14/16] (narrow) %v159_v27, 32  ;;  %v219_v27 = vld [vmem:[%s882_s24 + $0x248] sm:$0xff] }
  0x53   : > { %320 = vxpose.xlu1.b32.cont [15/16] (narrow) %v176_v28, 32  ;;  %v236_v28 = vld [vmem:[%s882_s24 + $0x2d0] sm:$0xff] }
  0x54   : > { %288 = vxpose.xlu0.b32.cont [15/16] (narrow) %v160_v29, 32  ;;  %v220_v29 = vld [vmem:[%s882_s24 + $0x250] sm:$0xff] }
  0x57   : > { %321 = vxpose.xlu1.b32.end [16/16] (narrow) %v177_v30, 32  ;;  %v237_v30 = vld [vmem:[%s882_s24 + $0x2d8] sm:$0xff] }
  0x58   : > { %289 = vxpose.xlu0.b32.end [16/16] (narrow) %v161_v31, 32  ;;  %v221_v31 = vld [vmem:[%s882_s24 + $0x258] sm:$0xff] }
  0x5b   : > { %370 = vxpose.xlu1.b32.start [1/16] (narrow) %v194_v32, 32  ;;  %v238_v32 = vld [vmem:[%s882_s24 + $0x2e0] sm:$0xff] }
  0x5c   : > { %338 = vxpose.xlu0.b32.start [1/16] (narrow) %v178_v33, 32  ;;  %v222_v33 = vld [vmem:[%s882_s24 + $0x260] sm:$0xff] }
  0x5f   : > { %371 = vxpose.xlu1.b32.cont [2/16] (narrow) %v195_v34, 32  ;;  %v239_v34 = vld [vmem:[%s882_s24 + $0x2e8] sm:$0xff] }
  0x60   : > { %339 = vxpose.xlu0.b32.cont [2/16] (narrow) %v179_v35, 32  ;;  %v223_v35 = vld [vmem:[%s882_s24 + $0x268] sm:$0xff] }
  0x63   : > { %372 = vxpose.xlu1.b32.cont [3/16] (narrow) %v196_v36, 32  ;;  %v240_v36 = vld [vmem:[%s882_s24 + $0x2f0] sm:$0xff] }
  0x64   : > { %340 = vxpose.xlu0.b32.cont [3/16] (narrow) %v180_v37, 32  ;;  %v224_v37 = vld [vmem:[%s882_s24 + $0x270] sm:$0xff] }
  0x67   : > { %373 = vxpose.xlu1.b32.cont [4/16] (narrow) %v197_v38, 32  ;;  %v241_v38 = vld [vmem:[%s882_s24 + $0x2f8] sm:$0xff] }
  0x68   : > { %341 = vxpose.xlu0.b32.cont [4/16] (narrow) %v181_v39, 32  ;;  %v225_v39 = vld [vmem:[%s882_s24 + $0x278] sm:$0xff] }
  0x6b   : > { %374 = vxpose.xlu1.b32.cont [5/16] (narrow) %v198_v40, 32  ;;  %v258_v40 = vld [vmem:[%s882_s24 + $0x380] sm:$0xff] }
  0x6c   : > { %342 = vxpose.xlu0.b32.cont [5/16] (narrow) %v182_v41, 32  ;;  %v242_v41 = vld [vmem:[%s882_s24 + $0x300] sm:$0xff] }
  0x6f   : > { %375 = vxpose.xlu1.b32.cont [6/16] (narrow) %v199_v42, 32 }
  0x70   : > { %343 = vxpose.xlu0.b32.cont [6/16] (narrow) %v183_v43, 32 }
  0x73   : > { %376 = vxpose.xlu1.b32.cont [7/16] (narrow) %v200_v44, 32  ;;  %v259_v44 = vld [vmem:[%s882_s24 + $0x388] sm:$0xff] }
  0x74   : > { %344 = vxpose.xlu0.b32.cont [7/16] (narrow) %v184_v45, 32  ;;  %v243_v45 = vld [vmem:[%s882_s24 + $0x308] sm:$0xff] }
  0x77   : > { %377 = vxpose.xlu1.b32.cont [8/16] (narrow) %v201_v46, 32 }
  0x78   : > { %345 = vxpose.xlu0.b32.cont [8/16] (narrow) %v185_v47, 32 }
  0x7b   : > { %378 = vxpose.xlu1.b32.cont [9/16] (narrow) %v202_v48, 32  ;;  %v260_v48 = vld [vmem:[%s882_s24 + $0x390] sm:$0xff] }
  0x7c   : > { %346 = vxpose.xlu0.b32.cont [9/16] (narrow) %v186_v49, 32  ;;  %v244_v49 = vld [vmem:[%s882_s24 + $0x310] sm:$0xff] }
  0x7f   : > { %379 = vxpose.xlu1.b32.cont [10/16] (narrow) %v203_v50, 32 }
  0x80   : > { %347 = vxpose.xlu0.b32.cont [10/16] (narrow) %v187_v51, 32 }
  0x83   : > { %380 = vxpose.xlu1.b32.cont [11/16] (narrow) %v204_v52, 32  ;;  %v261_v52 = vld [vmem:[%s882_s24 + $0x398] sm:$0xff] }
  0x84   : > { %348 = vxpose.xlu0.b32.cont [11/16] (narrow) %v188_v53, 32  ;;  %v245_v53 = vld [vmem:[%s882_s24 + $0x318] sm:$0xff] }
  0x87   : > { %381 = vxpose.xlu1.b32.cont [12/16] (narrow) %v205_v54, 32 }
  0x88   : > { %349 = vxpose.xlu0.b32.cont [12/16] (narrow) %v189_v55, 32 }
  0x8b   : > { %382 = vxpose.xlu1.b32.cont [13/16] (narrow) %v206_v56, 32  ;;  %v262_v56 = vld [vmem:[%s882_s24 + $0x3a0] sm:$0xff] }
  0x8c   : > { %350 = vxpose.xlu0.b32.cont [13/16] (narrow) %v190_v57, 32  ;;  %v246_v57 = vld [vmem:[%s882_s24 + $0x320] sm:$0xff] }
  0x8f   : > { %383 = vxpose.xlu1.b32.cont [14/16] (narrow) %v207_v58, 32  ;;  %v263_v58 = vld [vmem:[%s882_s24 + $0x3a8] sm:$0xff] }
  0x90   : > { %351 = vxpose.xlu0.b32.cont [14/16] (narrow) %v191_v59, 32  ;;  %v247_v59 = vld [vmem:[%s882_s24 + $0x328] sm:$0xff] }
  0x93   : > { %384 = vxpose.xlu1.b32.cont [15/16] (narrow) %v208_v60, 32  ;;  %v264_v60 = vld [vmem:[%s882_s24 + $0x3b0] sm:$0xff] }
  0x94   : > { %352 = vxpose.xlu0.b32.cont [15/16] (narrow) %v192_v61, 32  ;;  %v248_v61 = vld [vmem:[%s882_s24 + $0x330] sm:$0xff] }
  0x97   : > { %385 = vxpose.xlu1.b32.end [16/16] (narrow) %v209_v62, 32  ;;  %v265_v62 = vld [vmem:[%s882_s24 + $0x3b8] sm:$0xff] }
  0x98   : > { %353 = vxpose.xlu0.b32.end [16/16] (narrow) %v193_v63, 32  ;;  %v249_v63 = vld [vmem:[%s882_s24 + $0x338] sm:$0xff] }
  0x9b   : > { %434 = vxpose.xlu1.b32.start [1/16] (narrow) %v226_v0, 32  ;;  %v322_v2 = vpop.trf.xlu1  ;;  %v266_v0 = vld [vmem:[%s882_s24 + $0x3c0] sm:$0xff] }
  0x9c   : > { %402 = vxpose.xlu0.b32.start [1/16] (narrow) %v210_v1, 32  ;;  %v290_v3 = vpop.trf.xlu0  ;;  %531 = vst [vmem:[%s955_s27 + $0x8] sm:$0xff] %v322_v2  ;;  %v250_v1 = vld [vmem:[%s882_s24 + $0x340] sm:$0xff]  ;;  %v267_v2 = vld [vmem:[%s882_s24 + $0x3c8] sm:$0xff] }
  0x9d   : > { %530 = vst [vmem:[%s955_s27] sm:$0xff] %v290_v3  ;;  %v251_v3 = vld [vmem:[%s882_s24 + $0x348] sm:$0xff] }
  0x9f   : > { %435 = vxpose.xlu1.b32.cont [2/16] (narrow) %v227_v4, 32  ;;  %v323_v6 = vpop.trf.xlu1  ;;  %v268_v4 = vld [vmem:[%s882_s24 + $0x3d0] sm:$0xff] }
  0xa0   : > { %403 = vxpose.xlu0.b32.cont [2/16] (narrow) %v211_v5, 32  ;;  %v291_v7 = vpop.trf.xlu0  ;;  %539 = vst [vmem:[%s955_s27 + $0x48] sm:$0xff] %v323_v6  ;;  %v252_v5 = vld [vmem:[%s882_s24 + $0x350] sm:$0xff]  ;;  %v269_v6 = vld [vmem:[%s882_s24 + $0x3d8] sm:$0xff] }
  0xa1   : > { %538 = vst [vmem:[%s955_s27 + $0x40] sm:$0xff] %v291_v7  ;;  %v253_v7 = vld [vmem:[%s882_s24 + $0x358] sm:$0xff] }
  0xa3   : > { %436 = vxpose.xlu1.b32.cont [3/16] (narrow) %v228_v8, 32  ;;  %v324_v10 = vpop.trf.xlu1  ;;  %v270_v8 = vld [vmem:[%s882_s24 + $0x3e0] sm:$0xff] }
  0xa4   : > { %404 = vxpose.xlu0.b32.cont [3/16] (narrow) %v212_v9, 32  ;;  %v292_v11 = vpop.trf.xlu0  ;;  %547 = vst [vmem:[%s955_s27 + $0x88] sm:$0xff] %v324_v10  ;;  %v254_v9 = vld [vmem:[%s882_s24 + $0x360] sm:$0xff]  ;;  %v271_v10 = vld [vmem:[%s882_s24 + $0x3e8] sm:$0xff] }
  0xa5   : > { %546 = vst [vmem:[%s955_s27 + $0x80] sm:$0xff] %v292_v11  ;;  %v255_v11 = vld [vmem:[%s882_s24 + $0x368] sm:$0xff] }
  0xa7   : > { %437 = vxpose.xlu1.b32.cont [4/16] (narrow) %v229_v12, 32  ;;  %v325_v14 = vpop.trf.xlu1  ;;  %v272_v12 = vld [vmem:[%s882_s24 + $0x3f0] sm:$0xff] }
  0xa8   : > { %405 = vxpose.xlu0.b32.cont [4/16] (narrow) %v213_v13, 32  ;;  %v293_v15 = vpop.trf.xlu0  ;;  %555 = vst [vmem:[%s955_s27 + $0xc8] sm:$0xff] %v325_v14  ;;  %v256_v13 = vld [vmem:[%s882_s24 + $0x370] sm:$0xff]  ;;  %v273_v14 = vld [vmem:[%s882_s24 + $0x3f8] sm:$0xff] }
  0xa9   : > { %554 = vst [vmem:[%s955_s27 + $0xc0] sm:$0xff] %v293_v15  ;;  %v257_v15 = vld [vmem:[%s882_s24 + $0x378] sm:$0xff] }
  0xab   : > { %438 = vxpose.xlu1.b32.cont [5/16] (narrow) %v230_v16, 32 }
  0xac   : > { %406 = vxpose.xlu0.b32.cont [5/16] (narrow) %v214_v17, 32 }
  0xaf   : > { %439 = vxpose.xlu1.b32.cont [6/16] (narrow) %v231_v18, 32 }
  0xb0   : > { %407 = vxpose.xlu0.b32.cont [6/16] (narrow) %v215_v19, 32 }
  0xb3   : > { %440 = vxpose.xlu1.b32.cont [7/16] (narrow) %v232_v20, 32 }
  0xb4   : > { %408 = vxpose.xlu0.b32.cont [7/16] (narrow) %v216_v21, 32 }
  0xb7   : > { %441 = vxpose.xlu1.b32.cont [8/16] (narrow) %v233_v22, 32 }
  0xb8   : > { %409 = vxpose.xlu0.b32.cont [8/16] (narrow) %v217_v23, 32 }
  0xbb   : > { %442 = vxpose.xlu1.b32.cont [9/16] (narrow) %v234_v24, 32 }
  0xbc   : > { %410 = vxpose.xlu0.b32.cont [9/16] (narrow) %v218_v25, 32 }
  0xbf   : > { %443 = vxpose.xlu1.b32.cont [10/16] (narrow) %v235_v26, 32 }
  0xc0   : > { %411 = vxpose.xlu0.b32.cont [10/16] (narrow) %v219_v27, 32 }
  0xc3   : > { %444 = vxpose.xlu1.b32.cont [11/16] (narrow) %v236_v28, 32 }
  0xc4   : > { %412 = vxpose.xlu0.b32.cont [11/16] (narrow) %v220_v29, 32 }
  0xc7   : > { %445 = vxpose.xlu1.b32.cont [12/16] (narrow) %v237_v30, 32 }
  0xc8   : > { %413 = vxpose.xlu0.b32.cont [12/16] (narrow) %v221_v31, 32 }
  0xcb   : > { %446 = vxpose.xlu1.b32.cont [13/16] (narrow) %v238_v32, 32 }
  0xcc   : > { %414 = vxpose.xlu0.b32.cont [13/16] (narrow) %v222_v33, 32 }
  0xcf   : > { %447 = vxpose.xlu1.b32.cont [14/16] (narrow) %v239_v34, 32 }
  0xd0   : > { %415 = vxpose.xlu0.b32.cont [14/16] (narrow) %v223_v35, 32 }
  0xd3   : > { %448 = vxpose.xlu1.b32.cont [15/16] (narrow) %v240_v36, 32 }
  0xd4   : > { %416 = vxpose.xlu0.b32.cont [15/16] (narrow) %v224_v37, 32 }
  0xd7   : > { %449 = vxpose.xlu1.b32.end [16/16] (narrow) %v241_v38, 32 }
  0xd8   : > { %417 = vxpose.xlu0.b32.end [16/16] (narrow) %v225_v39, 32 }
  0xdb   : > { %498 = vxpose.xlu1.b32.start [1/16] (narrow) %v258_v40, 32  ;;  %v386_v42 = vpop.trf.xlu1 }
  0xdc   : > { %466 = vxpose.xlu0.b32.start [1/16] (narrow) %v242_v41, 32  ;;  %v354_v43 = vpop.trf.xlu0  ;;  %533 = vst [vmem:[%s955_s27 + $0x18] sm:$0xff] %v386_v42 }
  0xdd   : > { %532 = vst [vmem:[%s955_s27 + $0x10] sm:$0xff] %v354_v43 }
  0xdf   : > { %499 = vxpose.xlu1.b32.cont [2/16] (narrow) %v259_v44, 32  ;;  %v387_v46 = vpop.trf.xlu1 }
  0xe0   : > { %467 = vxpose.xlu0.b32.cont [2/16] (narrow) %v243_v45, 32  ;;  %v355_v47 = vpop.trf.xlu0  ;;  %541 = vst [vmem:[%s955_s27 + $0x58] sm:$0xff] %v387_v46 }
  0xe1   : > { %540 = vst [vmem:[%s955_s27 + $0x50] sm:$0xff] %v355_v47 }
  0xe3   : > { %500 = vxpose.xlu1.b32.cont [3/16] (narrow) %v260_v48, 32  ;;  %v388_v50 = vpop.trf.xlu1 }
  0xe4   : > { %468 = vxpose.xlu0.b32.cont [3/16] (narrow) %v244_v49, 32  ;;  %v356_v51 = vpop.trf.xlu0  ;;  %549 = vst [vmem:[%s955_s27 + $0x98] sm:$0xff] %v388_v50 }
  0xe5   : > { %548 = vst [vmem:[%s955_s27 + $0x90] sm:$0xff] %v356_v51 }
  0xe7   : > { %501 = vxpose.xlu1.b32.cont [4/16] (narrow) %v261_v52, 32  ;;  %v389_v54 = vpop.trf.xlu1 }
  0xe8   : > { %469 = vxpose.xlu0.b32.cont [4/16] (narrow) %v245_v53, 32  ;;  %v357_v55 = vpop.trf.xlu0  ;;  %557 = vst [vmem:[%s955_s27 + $0xd8] sm:$0xff] %v389_v54 }
  0xe9   : > { %556 = vst [vmem:[%s955_s27 + $0xd0] sm:$0xff] %v357_v55 }
  0xeb   : > { %502 = vxpose.xlu1.b32.cont [5/16] (narrow) %v262_v56, 32 }
  0xec   : > { %470 = vxpose.xlu0.b32.cont [5/16] (narrow) %v246_v57, 32 }
  0xef   : > { %503 = vxpose.xlu1.b32.cont [6/16] (narrow) %v263_v58, 32 }
  0xf0   : > { %471 = vxpose.xlu0.b32.cont [6/16] (narrow) %v247_v59, 32 }
  0xf3   : > { %504 = vxpose.xlu1.b32.cont [7/16] (narrow) %v264_v60, 32 }
  0xf4   : > { %472 = vxpose.xlu0.b32.cont [7/16] (narrow) %v248_v61, 32 }
  0xf7   : > { %505 = vxpose.xlu1.b32.cont [8/16] (narrow) %v265_v62, 32 }
  0xf8   : > { %473 = vxpose.xlu0.b32.cont [8/16] (narrow) %v249_v63, 32 }
  0xfb   : > { %506 = vxpose.xlu1.b32.cont [9/16] (narrow) %v266_v0, 32 }
  0xfc   : > { %474 = vxpose.xlu0.b32.cont [9/16] (narrow) %v250_v1, 32 }
  0xff   : > { %507 = vxpose.xlu1.b32.cont [10/16] (narrow) %v267_v2, 32 }
 0x100   : > { %475 = vxpose.xlu0.b32.cont [10/16] (narrow) %v251_v3, 32 }
 0x103   : > { %508 = vxpose.xlu1.b32.cont [11/16] (narrow) %v268_v4, 32 }
 0x104   : > { %476 = vxpose.xlu0.b32.cont [11/16] (narrow) %v252_v5, 32 }
 0x107   : > { %509 = vxpose.xlu1.b32.cont [12/16] (narrow) %v269_v6, 32 }
 0x108   : > { %477 = vxpose.xlu0.b32.cont [12/16] (narrow) %v253_v7, 32 }
 0x10b   : > { %510 = vxpose.xlu1.b32.cont [13/16] (narrow) %v270_v8, 32 }
 0x10c   : > { %478 = vxpose.xlu0.b32.cont [13/16] (narrow) %v254_v9, 32 }
 0x10f   : > { %511 = vxpose.xlu1.b32.cont [14/16] (narrow) %v271_v10, 32 }
 0x110   : > { %479 = vxpose.xlu0.b32.cont [14/16] (narrow) %v255_v11, 32 }
 0x113   : > { %512 = vxpose.xlu1.b32.cont [15/16] (narrow) %v272_v12, 32 }
 0x114   : > { %480 = vxpose.xlu0.b32.cont [15/16] (narrow) %v256_v13, 32 }
 0x117   : > { %513 = vxpose.xlu1.b32.end [16/16] (narrow) %v273_v14, 32 }
 0x118   : > { %481 = vxpose.xlu0.b32.end [16/16] (narrow) %v257_v15, 32 }
 0x11b   : > { %v450_v16 = vpop.trf.xlu1 }
 0x11c   : > { %v418_v17 = vpop.trf.xlu0  ;;  %535 = vst [vmem:[%s955_s27 + $0x28] sm:$0xff] %v450_v16 }
 0x11d   : > { %534 = vst [vmem:[%s955_s27 + $0x20] sm:$0xff] %v418_v17 }
 0x11f   : > { %v451_v18 = vpop.trf.xlu1 }
 0x120   : > { %v419_v19 = vpop.trf.xlu0  ;;  %543 = vst [vmem:[%s955_s27 + $0x68] sm:$0xff] %v451_v18 }
 0x121   : > { %542 = vst [vmem:[%s955_s27 + $0x60] sm:$0xff] %v419_v19 }
 0x123   : > { %v452_v20 = vpop.trf.xlu1 }
 0x124   : > { %v420_v21 = vpop.trf.xlu0  ;;  %551 = vst [vmem:[%s955_s27 + $0xa8] sm:$0xff] %v452_v20 }
 0x125   : > { %550 = vst [vmem:[%s955_s27 + $0xa0] sm:$0xff] %v420_v21 }
 0x127   : > { %v453_v22 = vpop.trf.xlu1 }
 0x128   : > { %v421_v23 = vpop.trf.xlu0  ;;  %559 = vst [vmem:[%s955_s27 + $0xe8] sm:$0xff] %v453_v22 }
 0x129   : > { %558 = vst [vmem:[%s955_s27 + $0xe0] sm:$0xff] %v421_v23 }
 0x15b   : > { %v514_v24 = vpop.trf.xlu1 }
 0x15c   : > { %v482_v25 = vpop.trf.xlu0  ;;  %537 = vst [vmem:[%s955_s27 + $0x38] sm:$0xff] %v514_v24 }
 0x15d   : > { %536 = vst [vmem:[%s955_s27 + $0x30] sm:$0xff] %v482_v25 }
 0x15f   : > { %v515_v26 = vpop.trf.xlu1 }
 0x160   : > { %v483_v27 = vpop.trf.xlu0  ;;  %545 = vst [vmem:[%s955_s27 + $0x78] sm:$0xff] %v515_v26 }
 0x161   : > { %544 = vst [vmem:[%s955_s27 + $0x70] sm:$0xff] %v483_v27 }
 0x163   : > { %v516_v28 = vpop.trf.xlu1 }
 0x164   : > { %v484_v29 = vpop.trf.xlu0  ;;  %553 = vst [vmem:[%s955_s27 + $0xb8] sm:$0xff] %v516_v28 }
 0x165   : > { %552 = vst [vmem:[%s955_s27 + $0xb0] sm:$0xff] %v484_v29 }
 0x167   : > { %v517_v30 = vpop.trf.xlu1 }
 0x168   : > { %v485_v31 = vpop.trf.xlu0  ;;  %561 = vst [vmem:[%s955_s27 + $0xf8] sm:$0xff] %v517_v30 }
 0x169   : > { %560 = vst [vmem:[%s955_s27 + $0xf0] sm:$0xff] %v485_v31 }
 0x16a   : > { %742 = shalt.err (!%p739_p5)
}
 0x16b   : > { %s743_s15 = scalar_lea.hbm %s1052_s3, 4096  ;;  %s747_s21 = scalar_lea.hbm %s1107_s1, 8192 }
 0x16c   : > { %p744_p6 = scmp.ne.s32.totalorder %s1052_s3, %s743_s15  ;;  %p748_p10 = scmp.lt.u32.totalorder %s1052_s3, %s1107_s1 }
 0x16d   : > { %p749_p11 = scmp.lt.u32.totalorder %s747_s21, %s743_s15  ;;  %p751_p13 = scmp.lt.u32.totalorder %s743_s15, %s1052_s3 }
 0x16e   : > { %p745_p7 = pnand %p744_p6, %p862_p4 }
 0x16f   : > { %p750_p12 = por %p749_p11, %p748_p10 }
 0x170   : > { %p746_p9 = pneg %p745_p7 }
 0x171   : > { %p752_p0 = por %p751_p13, %p750_p12 }
 0x173   : > { %p753_p1 = pnand %p752_p0, %p746_p9 }
 0x175   : > { %756 = shalt.err (!%p753_p1)
}
 0x176   : > { %s810_s24 = smov 1024   ;;  %s811_s25 = smov 64  }
 0x177   : > { %672 = dma.vmem_to_hbm [thread:$0]  (%p862_p4), %s1054_s29, 4096, %s1052_s3, %s1060_s4, %s810_s24, %s810_s24, %s811_s25  }
 0x178 PF: > { %p678_p2 = scmp.ge.s32.totalorder %s807_s11, 2  ;;  %s593_s26 = sand.u32 1, %s787_s6  }
 0x179   : > { %s594_s27 = scalar_lea.sflag [#allocation3], %s593_s26 }
 0x17a   : > { %p675_p3 = pnand %p678_p2, %p869_p8 }
 0x17c   : > { %782 = dma.done.wait (!%p675_p3), %s594_s27, 4096  }
 0x17d   : > { %784 = vsyncadd (!%p675_p3), %s594_s27, 4294963200  ;;  %s14_s11 = sadd.s32 1, %s807_s11   ;;  %s1110_s6 = smov %s791_s7 }
 0x17e   : > { %p11_p5 = scmp.ge.s32.totalorder %s14_s11, 4   ;;  %s1111_s7 = smov %s795_s8 }
 0x17f   : > { %s1112_s8 = smov %s875_s19  ;;  %s1113_s9 = smov %s803_s10 }
 0x180   : > { %s1114_s10 = smov %s1116_s14  ;;  %13 = sbr.rel (!%p11_p5) target bundleno = 4 (0x4), region = 59 }
 0x187   :  { %599 = vsyncpa [#allocation3], 1 }
 0x188   :  { %601 = vsyncpa [#allocation3 + $0x1], 1 }

</bundles_post_ra>
